<compile_context>
chip_gen: v7x
topology: tpu7x:2x2x1
jax: 0.10.0
libtpu: 0.0.40
codegen_flags: <defaults>
</compile_context>

<pallas_src>
import math

import numpy as np

import jax
import jax.numpy as jnp
from jax.experimental import pallas as pl
from jax.experimental.pallas import tpu as pltpu

D_H = 32          # hidden size d_h
N_HEADS = 4
SEQ = 8           # number of key/value tokens
BATCH = 2
LN_EPS = 1e-5


def _gelu(x):
    # exact tanh-approx gelu from the reference code
    return 0.5 * x * (1.0 + jnp.tanh(math.sqrt(2.0 / math.pi)
                                     * (x + 0.044715 * x * x * x)))


# ---------------------------------------------------------------------------
# Kernel
# ---------------------------------------------------------------------------
def block_kernel(q_ref, k_ref, m_ref, c_ref, o_ref):
    # q_ref: [b, 1, D]   query tokens for this grid step
    # k_ref: [b, S, D]   key/value tokens
    # m_ref: [b, S, 1]   mask, 1.0 = keep, 0.0 = masked
    # c_ref: [7D+H+3, 4D] packed constants:
    #        rows [0,D)      : [wq|wk|wv|wo]
    #        rows [D,2D)     : w1
    #        rows [2D,6D)    : w2 (lanes [0,D), rest zero)
    #        rows [6D,7D)    : seg^T  [D,H]  (lanes [0,H))
    #        rows [7D,7D+H)  : seg    [H,D]  (lanes [0,D))
    #        row  7D+H       : [bq|bk|bv|bo]
    #        row  7D+H+1     : b1
    #        row  7D+H+2     : [b2 | ln1_gamma | ln1_beta | 0]
    # o_ref: [b, 1, D]
    b = q_ref.shape[0]
    D = q_ref.shape[-1]
    S = k_ref.shape[1]
    H = N_HEADS
    dh = D // H
    scale = 1.0 / math.sqrt(dh)

    # --- constant slab (static slices; packed once on the host) ---
    wproj = c_ref[0:D, :]                       # [D, 4D] = [wq|wk|wv|wo]
    w1 = c_ref[D:2 * D, :]                      # [D, 4D]
    w2 = c_ref[2 * D:6 * D, 0:D]                # [4D, D]
    segT = c_ref[6 * D:7 * D, 0:H]              # [D, H]
    seg = c_ref[7 * D:7 * D + H, 0:D]           # [H, D]
    bproj = c_ref[7 * D + H:7 * D + H + 1, :]   # [1, 4D] = [bq|bk|bv|bo]
    b1 = c_ref[7 * D + H + 1:7 * D + H + 2, :]  # [1, 4D]
    misc = c_ref[7 * D + H + 2:7 * D + H + 3, :]
    b2 = misc[:, 0:D]                           # [1, D]
    g1 = misc[:, D:2 * D]                       # [1, D]  ln_1 gamma
    be1 = misc[:, 2 * D:3 * D]                  # [1, D]  ln_1 beta
    wo = wproj[:, 3 * D:]                       # [D, D]
    bo = bproj[:, 3 * D:]                       # [1, D]

    # --- input projections (no wrapper-side concat; two independent matmuls) ---
    q2 = q_ref[...].reshape(b, D)
    k2 = k_ref[...].reshape(b * S, D)
    qproj = jnp.dot(q2, wproj, preferred_element_type=jnp.float32) + bproj  # [b, 4D]
    kproj = jnp.dot(k2, wproj, preferred_element_type=jnp.float32) + bproj  # [bS, 4D]

    Q = qproj[:, 0:D]                                                   # [b, D]
    K = kproj[:, D:2 * D].reshape(b, S, D)                              # [b, S, D]
    V = kproj[:, 2 * D:3 * D].reshape(b, S, D)                          # [b, S, D]

    # --- attention scores for all heads at once ---
    # scores[b, s, h] = scale * sum_{d in head h} Q[b, d] * K[b, s, d]
    prod = Q.reshape(b, 1, D) * K                                       # [b, S, D]
    scores = jnp.dot(prod.reshape(b * S, D), segT,
                     preferred_element_type=jnp.float32
                     ).reshape(b, S, H) * scale                         # [b, S, H]

    # additive mask bias, computed once, broadcast over the head lanes
    # (equivalent to where(mask==0, -1e9) for the {0,1} masks the module uses)
    neg_bias = (m_ref[...] - 1.0) * 1e9                                 # [b, S, 1]
    scores = scores + neg_bias

    # softmax over S (exact divide; the approx reciprocal cost nothing but error)
    s_max = jnp.max(scores, axis=1, keepdims=True)                      # [b, 1, H]
    e = jnp.exp(scores - s_max)                                         # [b, S, H]
    denom = jnp.sum(e, axis=1, keepdims=True)                           # [b, 1, H]
    p = e / denom                                                       # [b, S, H]

    # expand per-head weights back over their lane segments, reduce over S
    p_exp = jnp.dot(p.reshape(b * S, H), seg,
                    preferred_element_type=jnp.float32).reshape(b, S, D)
    ctx = jnp.sum(p_exp * V, axis=1)                                    # [b, D]

    attn_out = jnp.dot(ctx, wo, preferred_element_type=jnp.float32) + bo  # [b, D]

    # --- ln_1 (used twice, as in the reference forward; ln_2 is unused) ---
    def layer_norm(v):
        mu = jnp.mean(v, axis=-1, keepdims=True)
        cen = v - mu
        var = jnp.mean(cen * cen, axis=-1, keepdims=True)
        return cen * jax.lax.rsqrt(var + LN_EPS) * g1 + be1

    t = layer_norm(attn_out)

    # --- MLP: l2(gelu(l1(t))) (dropout = identity in eval) ---
    h1 = _gelu(jnp.dot(t, w1, preferred_element_type=jnp.float32) + b1)   # [b, 4D]
    h2 = jnp.dot(h1, w2, preferred_element_type=jnp.float32) + b2         # [b, D]

    o_ref[...] = layer_norm(h2 + t).reshape(b, 1, D)


# ---------------------------------------------------------------------------
# Host-side packing (done ONCE at parameter-init time, not per forward call)
# ---------------------------------------------------------------------------
def pack_params(p):
    D = p["wq"].shape[0]
    H = N_HEADS
    dh = D // H
    D4 = 4 * D

    # head-segment one-hot: seg[h, d] = 1.0 iff lane d belongs to head h
    seg_np = np.kron(np.eye(H, dtype=np.float32), np.ones((1, dh), np.float32))

    wproj = jnp.concatenate([p["wq"], p["wk"], p["wv"], p["wo"]], axis=1)   # [D, 4D]
    w2pad = jnp.pad(p["w2"], ((0, 0), (0, D4 - D)))                         # [4D, 4D]
    segT = jnp.pad(jnp.asarray(seg_np.T), ((0, 0), (0, D4 - H)))            # [D, 4D]
    seg = jnp.pad(jnp.asarray(seg_np), ((0, 0), (0, D4 - D)))               # [H, 4D]
    bproj = jnp.concatenate([p["bq"], p["bk"], p["bv"], p["bo"]], axis=1)   # [1, 4D]
    misc = jnp.concatenate([p["b2"], p["g1"], p["be1"],
                            jnp.zeros((1, D), jnp.float32)], axis=1)        # [1, 4D]

    slab = jnp.concatenate(
        [wproj, p["w1"], w2pad, segT, seg, bproj, p["b1"], misc], axis=0)
    assert slab.shape == (7 * D + H + 3, D4)
    return slab


# ---------------------------------------------------------------------------
# Wrapper
# ---------------------------------------------------------------------------
def block_forward(q, k, m, const_slab, *, block_b=1):
    """q: [B, 1, D], k: [B, S, D], m: [B, 1, S], const_slab from pack_params."""
    B, _, D = q.shape
    S = k.shape[1]
    H = N_HEADS
    rows = const_slab.shape[0]
    assert B % block_b == 0

    # free reshape ([B,1,S] and [B,S,1] share the same linearization)
    m3 = m.reshape(B, S, 1)

    flops = int(2 * B * D * 4 * D            # q projection
                + 2 * B * S * D * 4 * D      # k projection
                + 2 * B * S * D * H          # head-segment scores
                + 2 * B * S * H * D          # prob expansion
                + 2 * B * D * D              # output projection
                + 2 * B * D * 4 * D          # l1
                + 2 * B * 4 * D * D          # l2
                + 20 * B * S * D)            # elementwise / softmax / LN
    transcendentals = int(B * S * H + B * 4 * D + 4 * B)
    bytes_accessed = int(4 * (B * D + B * S * D + B * S
                              + rows * 4 * D + B * D))

    out3 = pl.pallas_call(
        block_kernel,
        out_shape=jax.ShapeDtypeStruct((B, 1, D), jnp.float32),
        grid=(B // block_b,),
        in_specs=[
            pl.BlockSpec((block_b, 1, D), lambda i: (i, 0, 0)),
            pl.BlockSpec((block_b, S, D), lambda i: (i, 0, 0)),
            pl.BlockSpec((block_b, S, 1), lambda i: (i, 0, 0)),
            pl.BlockSpec((rows, 4 * D), lambda i: (0, 0)),   # resident constants
        ],
        out_specs=pl.BlockSpec((block_b, 1, D), lambda i: (i, 0, 0)),
        compiler_params=pltpu.CompilerParams(
            dimension_semantics=("parallel",)),               # v7x: both TCs
        cost_estimate=pl.CostEstimate(flops=flops,
                                      transcendentals=transcendentals,
                                      bytes_accessed=bytes_accessed),
    )(q, k, m3, const_slab)
    return out3.reshape(B, D)


# ---------------------------------------------------------------------------
# Pure-JAX reference (for verification)
# ---------------------------------------------------------------------------
def block_reference(q, k, m, p):
    B, _, D = q.shape
    S = k.shape[1]
    H, dh = N_HEADS, D // N_HEADS

    Q = q[:, 0, :] @ p["wq"] + p["bq"][0]
    K = jnp.einsum("bsd,de->bse", k, p["wk"]) + p["bk"][0]
    V = jnp.einsum("bsd,de->bse", k, p["wv"]) + p["bv"][0]

    Qh = Q.reshape(B, H, dh)
    Kh = K.reshape(B, S, H, dh)
    Vh = V.reshape(B, S, H, dh)

    s = jnp.einsum("bhd,bshd->bhs", Qh, Kh) / math.sqrt(dh)
    s = jnp.where(m == 0.0, -1e9, s)                      # broadcast over heads
    a = jax.nn.softmax(s, axis=-1)
    ctx = jnp.einsum("bhs,bshd->bhd", a, Vh).reshape(B, D)
    attn_out = ctx @ p["wo"] + p["bo"][0]

    def ln(x):
        mu = x.mean(-1, keepdims=True)
        var = ((x - mu) ** 2).mean(-1, keepdims=True)
        return (x - mu) / jnp.sqrt(var + LN_EPS) * p["g1"][0] + p["be1"][0]

    t = ln(attn_out)
    h1 = _gelu(t @ p["w1"] + p["b1"][0])
    h2 = h1 @ p["w2"] + p["b2"][0]
    return ln(h2 + t)


def init_params(key, d_h):
    d4 = 4 * d_h
    ks = jax.random.split(key, 12)
    n = lambda k, shape, scale: (jax.random.normal(k, shape, jnp.float32) * scale)
    return {
        "wq": n(ks[0], (d_h, d_h), 0.05), "bq": n(ks[1], (1, d_h), 0.02),
        "wk": n(ks[2], (d_h, d_h), 0.05), "bk": n(ks[3], (1, d_h), 0.02),
        "wv": n(ks[4], (d_h, d_h), 0.05), "bv": n(ks[5], (1, d_h), 0.02),
        "wo": n(ks[6], (d_h, d_h), 0.05), "bo": n(ks[7], (1, d_h), 0.02),
        "w1": n(ks[8], (d_h, d4), 0.05),  "b1": n(ks[9], (1, d4), 0.02),
        "w2": n(ks[10], (d4, d_h), 0.05), "b2": n(ks[11], (1, d_h), 0.02),
        "g1": jnp.ones((1, d_h), jnp.float32),   # ln_1 default init
        "be1": jnp.zeros((1, d_h), jnp.float32),
    }


if __name__ == "__main__":
    key = jax.random.PRNGKey(0)
    kq, kk, kp = jax.random.split(key, 3)

    q = jax.random.normal(kq, (BATCH, 1, D_H), jnp.float32)
    k = jax.random.normal(kk, (BATCH, SEQ, D_H), jnp.float32)
    # mask: keep first SEQ-2 keys, mask the last two
    m = jnp.ones((BATCH, 1, SEQ), jnp.float32).at[:, :, SEQ - 2:].set(0.0)

    params = init_params(kp, D_H)
    # constants packed ONCE (hoisted out of the per-call path)
    const_slab = jax.block_until_ready(pack_params(params))

    out = block_forward(q, k, m, const_slab, block_b=1)
    out = jax.block_until_ready(out)

    # reference at full f32 matmul precision so the comparison is f32-vs-f32
    with jax.default_matmul_precision("highest"):
        ref = jax.block_until_ready(block_reference(q, k, m, params))

    assert out.shape == (BATCH, D_H)
    assert jnp.allclose(out, ref, rtol=1e-4, atol=1e-4), (
        f"max abs diff {jnp.max(jnp.abs(out - ref))}")

    print("KERNEL_OK")
</pallas_src>

<mosaic_0001>
module attributes {stable_mosaic.version = 11 : i64} {
  func.func @block_kernel(%arg0: i32, %arg1: memref<1x1x32xf32, #tpu.memory_space<vmem>>, %arg2: memref<1x8x32xf32, #tpu.memory_space<vmem>>, %arg3: memref<1x8x1xf32, #tpu.memory_space<vmem>>, %arg4: memref<231x128xf32, #tpu.memory_space<vmem>>, %arg5: memref<1x1x32xf32, #tpu.memory_space<vmem>>) attributes {dimension_semantics = [#tpu.dimension_semantics<parallel>], iteration_bounds = array<i64: 2>, scalar_prefetch = 0 : i64, scratch_operands = 0 : i64, tpu.core_type = #tpu.core_type<tc>, window_params = [{transform_indices = @transform_0, window_bounds = array<i64: 1, 1, 32>}, {transform_indices = @transform_1, window_bounds = array<i64: 1, 8, 32>}, {transform_indices = @transform_2, window_bounds = array<i64: 1, 8, 1>}, {pipeline_mode = #tpu.pipeline_mode<synchronous>, transform_indices = @transform_3, window_bounds = array<i64: 231, 128>}, {transform_indices = @transform_4, window_bounds = array<i64: 1, 1, 32>}]} {
    %c0 = arith.constant 0 : index
    %c0_0 = arith.constant 0 : index
    %0 = vector.load %arg4[%c0, %c0_0] : memref<231x128xf32, #tpu.memory_space<vmem>>, vector<32x128xf32>
    %c32 = arith.constant 32 : index
    %c0_1 = arith.constant 0 : index
    %1 = vector.load %arg4[%c32, %c0_1] : memref<231x128xf32, #tpu.memory_space<vmem>>, vector<32x128xf32>
    %c64 = arith.constant 64 : index
    %c0_2 = arith.constant 0 : index
    %2 = vector.load %arg4[%c64, %c0_2] : memref<231x128xf32, #tpu.memory_space<vmem>>, vector<128x32xf32>
    %c192 = arith.constant 192 : index
    %c0_3 = arith.constant 0 : index
    %3 = vector.load %arg4[%c192, %c0_3] : memref<231x128xf32, #tpu.memory_space<vmem>>, vector<32x4xf32>
    %c224 = arith.constant 224 : index
    %c0_4 = arith.constant 0 : index
    %4 = vector.load %arg4[%c224, %c0_4] : memref<231x128xf32, #tpu.memory_space<vmem>>, vector<4x32xf32>
    %c228 = arith.constant 228 : index
    %c0_5 = arith.constant 0 : index
    %5 = vector.load %arg4[%c228, %c0_5] : memref<231x128xf32, #tpu.memory_space<vmem>>, vector<1x128xf32>
    %c229 = arith.constant 229 : index
    %c0_6 = arith.constant 0 : index
    %6 = vector.load %arg4[%c229, %c0_6] : memref<231x128xf32, #tpu.memory_space<vmem>>, vector<1x128xf32>
    %c230 = arith.constant 230 : index
    %c0_7 = arith.constant 0 : index
    %7 = vector.load %arg4[%c230, %c0_7] : memref<231x128xf32, #tpu.memory_space<vmem>>, vector<1x128xf32>
    %8 = vector.extract_strided_slice %7 {offsets = [0, 0], sizes = [1, 32], strides = [1, 1]} : vector<1x128xf32> to vector<1x32xf32>
    %9 = vector.extract_strided_slice %7 {offsets = [0, 32], sizes = [1, 32], strides = [1, 1]} : vector<1x128xf32> to vector<1x32xf32>
    %10 = vector.extract_strided_slice %7 {offsets = [0, 64], sizes = [1, 32], strides = [1, 1]} : vector<1x128xf32> to vector<1x32xf32>
    %11 = vector.extract_strided_slice %0 {offsets = [0, 96], sizes = [32, 32], strides = [1, 1]} : vector<32x128xf32> to vector<32x32xf32>
    %12 = vector.extract_strided_slice %5 {offsets = [0, 96], sizes = [1, 32], strides = [1, 1]} : vector<1x128xf32> to vector<1x32xf32>
    %c0_8 = arith.constant 0 : index
    %c0_9 = arith.constant 0 : index
    %c0_10 = arith.constant 0 : index
    %13 = vector.load %arg1[%c0_8, %c0_9, %c0_10] : memref<1x1x32xf32, #tpu.memory_space<vmem>>, vector<1x1x32xf32>
    %14 = vector.shape_cast %13 : vector<1x1x32xf32> to vector<1x32xf32>
    %c0_11 = arith.constant 0 : index
    %c0_12 = arith.constant 0 : index
    %c0_13 = arith.constant 0 : index
    %15 = vector.load %arg2[%c0_11, %c0_12, %c0_13] : memref<1x8x32xf32, #tpu.memory_space<vmem>>, vector<1x8x32xf32>
    %16 = vector.shape_cast %15 : vector<1x8x32xf32> to vector<8x32xf32>
    %cst = arith.constant dense<0.000000e+00> : vector<1x128xf32>
    %17 = tpu.matmul %14, %0, %cst {dimension_numbers = #tpu.dot_dimension_numbers<[1], [0], [0], [1], [0, 0, 1, 1], [], []>} : vector<1x32xf32>, vector<32x128xf32>, vector<1x128xf32> -> vector<1x128xf32>
    %18 = arith.addf %17, %5 : vector<1x128xf32>
    %cst_14 = arith.constant dense<0.000000e+00> : vector<8x128xf32>
    %19 = tpu.matmul %16, %0, %cst_14 {dimension_numbers = #tpu.dot_dimension_numbers<[1], [0], [0], [1], [0, 0, 1, 1], [], []>} : vector<8x32xf32>, vector<32x128xf32>, vector<8x128xf32> -> vector<8x128xf32>
    %20 = vector.broadcast %5 : vector<1x128xf32> to vector<8x128xf32>
    %21 = arith.addf %19, %20 : vector<8x128xf32>
    %22 = vector.extract_strided_slice %18 {offsets = [0, 0], sizes = [1, 32], strides = [1, 1]} : vector<1x128xf32> to vector<1x32xf32>
    %23 = vector.extract_strided_slice %21 {offsets = [0, 32], sizes = [8, 32], strides = [1, 1]} : vector<8x128xf32> to vector<8x32xf32>
    %24 = vector.shape_cast %23 : vector<8x32xf32> to vector<1x8x32xf32>
    %25 = vector.extract_strided_slice %21 {offsets = [0, 64], sizes = [8, 32], strides = [1, 1]} : vector<8x128xf32> to vector<8x32xf32>
    %26 = vector.shape_cast %25 : vector<8x32xf32> to vector<1x8x32xf32>
    %27 = vector.shape_cast %22 : vector<1x32xf32> to vector<1x1x32xf32>
    %28 = vector.broadcast %27 : vector<1x1x32xf32> to vector<1x8x32xf32>
    %29 = arith.mulf %28, %24 : vector<1x8x32xf32>
    %30 = vector.shape_cast %29 : vector<1x8x32xf32> to vector<8x32xf32>
    %cst_15 = arith.constant dense<0.000000e+00> : vector<8x4xf32>
    %31 = tpu.matmul %30, %3, %cst_15 {dimension_numbers = #tpu.dot_dimension_numbers<[1], [0], [0], [1], [0, 0, 1, 1], [], []>} : vector<8x32xf32>, vector<32x4xf32>, vector<8x4xf32> -> vector<8x4xf32>
    %32 = vector.shape_cast %31 : vector<8x4xf32> to vector<1x8x4xf32>
    %cst_16 = arith.constant 0.353553385 : f32
    %33 = vector.broadcast %cst_16 : f32 to vector<1x8x4xf32>
    %34 = arith.mulf %32, %33 : vector<1x8x4xf32>
    %c0_17 = arith.constant 0 : index
    %c0_18 = arith.constant 0 : index
    %c0_19 = arith.constant 0 : index
    %35 = vector.load %arg3[%c0_17, %c0_18, %c0_19] : memref<1x8x1xf32, #tpu.memory_space<vmem>>, vector<1x8x1xf32>
    %cst_20 = arith.constant 1.000000e+00 : f32
    %36 = vector.broadcast %cst_20 : f32 to vector<1x8x1xf32>
    %37 = arith.subf %35, %36 : vector<1x8x1xf32>
    %cst_21 = arith.constant 1.000000e+09 : f32
    %38 = vector.broadcast %cst_21 : f32 to vector<1x8x1xf32>
    %39 = arith.mulf %37, %38 : vector<1x8x1xf32>
    %40 = vector.broadcast %39 : vector<1x8x1xf32> to vector<1x8x4xf32>
    %41 = arith.addf %34, %40 : vector<1x8x4xf32>
    %cst_22 = arith.constant dense<0xFF800000> : vector<1x4xf32>
    %42 = vector.multi_reduction <maximumf>, %41, %cst_22 [1] : vector<1x8x4xf32> to vector<1x4xf32>
    %43 = vector.shape_cast %42 : vector<1x4xf32> to vector<1x1x4xf32>
    %44 = vector.broadcast %43 : vector<1x1x4xf32> to vector<1x8x4xf32>
    %45 = arith.subf %41, %44 : vector<1x8x4xf32>
    %46 = math.exp %45 : vector<1x8x4xf32>
    %cst_23 = arith.constant dense<0.000000e+00> : vector<1x4xf32>
    %47 = vector.multi_reduction <add>, %46, %cst_23 [1] : vector<1x8x4xf32> to vector<1x4xf32>
    %48 = vector.shape_cast %47 : vector<1x4xf32> to vector<1x1x4xf32>
    %49 = vector.broadcast %48 : vector<1x1x4xf32> to vector<1x8x4xf32>
    %50 = arith.divf %46, %49 : vector<1x8x4xf32>
    %51 = vector.shape_cast %50 : vector<1x8x4xf32> to vector<8x4xf32>
    %cst_24 = arith.constant dense<0.000000e+00> : vector<8x32xf32>
    %52 = tpu.matmul %51, %4, %cst_24 {dimension_numbers = #tpu.dot_dimension_numbers<[1], [0], [0], [1], [0, 0, 1, 1], [], []>} : vector<8x4xf32>, vector<4x32xf32>, vector<8x32xf32> -> vector<8x32xf32>
    %53 = vector.shape_cast %52 : vector<8x32xf32> to vector<1x8x32xf32>
    %54 = arith.mulf %53, %26 : vector<1x8x32xf32>
    %cst_25 = arith.constant dense<0.000000e+00> : vector<1x32xf32>
    %55 = vector.multi_reduction <add>, %54, %cst_25 [1] : vector<1x8x32xf32> to vector<1x32xf32>
    %cst_26 = arith.constant dense<0.000000e+00> : vector<1x32xf32>
    %56 = tpu.matmul %55, %11, %cst_26 {dimension_numbers = #tpu.dot_dimension_numbers<[1], [0], [0], [1], [0, 0, 1, 1], [], []>} : vector<1x32xf32>, vector<32x32xf32>, vector<1x32xf32> -> vector<1x32xf32>
    %57 = arith.addf %56, %12 : vector<1x32xf32>
    %cst_27 = arith.constant dense<0.000000e+00> : vector<1xf32>
    %58 = vector.multi_reduction <add>, %57, %cst_27 [1] : vector<1x32xf32> to vector<1xf32>
    %59 = vector.shape_cast %58 : vector<1xf32> to vector<1x1xf32>
    %cst_28 = arith.constant 3.200000e+01 : f32
    %60 = vector.broadcast %cst_28 : f32 to vector<1x1xf32>
    %61 = arith.divf %59, %60 : vector<1x1xf32>
    %62 = vector.broadcast %61 : vector<1x1xf32> to vector<1x32xf32>
    %63 = arith.subf %57, %62 : vector<1x32xf32>
    %64 = arith.mulf %63, %63 : vector<1x32xf32>
    %cst_29 = arith.constant dense<0.000000e+00> : vector<1xf32>
    %65 = vector.multi_reduction <add>, %64, %cst_29 [1] : vector<1x32xf32> to vector<1xf32>
    %66 = vector.shape_cast %65 : vector<1xf32> to vector<1x1xf32>
    %cst_30 = arith.constant 3.200000e+01 : f32
    %67 = vector.broadcast %cst_30 : f32 to vector<1x1xf32>
    %68 = arith.divf %66, %67 : vector<1x1xf32>
    %cst_31 = arith.constant 9.99999974E-6 : f32
    %69 = vector.broadcast %cst_31 : f32 to vector<1x1xf32>
    %70 = arith.addf %68, %69 : vector<1x1xf32>
    %71 = math.rsqrt %70 : vector<1x1xf32>
    %72 = vector.broadcast %71 : vector<1x1xf32> to vector<1x32xf32>
    %73 = arith.mulf %63, %72 : vector<1x32xf32>
    %74 = arith.mulf %73, %9 : vector<1x32xf32>
    %75 = arith.addf %74, %10 : vector<1x32xf32>
    %cst_32 = arith.constant dense<0.000000e+00> : vector<1x128xf32>
    %76 = tpu.matmul %75, %1, %cst_32 {dimension_numbers = #tpu.dot_dimension_numbers<[1], [0], [0], [1], [0, 0, 1, 1], [], []>} : vector<1x32xf32>, vector<32x128xf32>, vector<1x128xf32> -> vector<1x128xf32>
    %77 = arith.addf %76, %6 : vector<1x128xf32>
    %cst_33 = arith.constant 5.000000e-01 : f32
    %78 = vector.broadcast %cst_33 : f32 to vector<1x128xf32>
    %79 = arith.mulf %78, %77 : vector<1x128xf32>
    %cst_34 = arith.constant 4.471500e-02 : f32
    %80 = vector.broadcast %cst_34 : f32 to vector<1x128xf32>
    %81 = arith.mulf %80, %77 : vector<1x128xf32>
    %82 = arith.mulf %81, %77 : vector<1x128xf32>
    %83 = arith.mulf %82, %77 : vector<1x128xf32>
    %84 = arith.addf %77, %83 : vector<1x128xf32>
    %cst_35 = arith.constant 0.797884583 : f32
    %85 = vector.broadcast %cst_35 : f32 to vector<1x128xf32>
    %86 = arith.mulf %85, %84 : vector<1x128xf32>
    %87 = math.tanh %86 : vector<1x128xf32>
    %cst_36 = arith.constant 1.000000e+00 : f32
    %88 = vector.broadcast %cst_36 : f32 to vector<1x128xf32>
    %89 = arith.addf %88, %87 : vector<1x128xf32>
    %90 = arith.mulf %79, %89 : vector<1x128xf32>
    %cst_37 = arith.constant dense<0.000000e+00> : vector<1x32xf32>
    %91 = tpu.matmul %90, %2, %cst_37 {dimension_numbers = #tpu.dot_dimension_numbers<[1], [0], [0], [1], [0, 0, 1, 1], [], []>} : vector<1x128xf32>, vector<128x32xf32>, vector<1x32xf32> -> vector<1x32xf32>
    %92 = arith.addf %91, %8 : vector<1x32xf32>
    %93 = arith.addf %92, %75 : vector<1x32xf32>
    %cst_38 = arith.constant dense<0.000000e+00> : vector<1xf32>
    %94 = vector.multi_reduction <add>, %93, %cst_38 [1] : vector<1x32xf32> to vector<1xf32>
    %95 = vector.shape_cast %94 : vector<1xf32> to vector<1x1xf32>
    %cst_39 = arith.constant 3.200000e+01 : f32
    %96 = vector.broadcast %cst_39 : f32 to vector<1x1xf32>
    %97 = arith.divf %95, %96 : vector<1x1xf32>
    %98 = vector.broadcast %97 : vector<1x1xf32> to vector<1x32xf32>
    %99 = arith.subf %93, %98 : vector<1x32xf32>
    %100 = arith.mulf %99, %99 : vector<1x32xf32>
    %cst_40 = arith.constant dense<0.000000e+00> : vector<1xf32>
    %101 = vector.multi_reduction <add>, %100, %cst_40 [1] : vector<1x32xf32> to vector<1xf32>
    %102 = vector.shape_cast %101 : vector<1xf32> to vector<1x1xf32>
    %cst_41 = arith.constant 3.200000e+01 : f32
    %103 = vector.broadcast %cst_41 : f32 to vector<1x1xf32>
    %104 = arith.divf %102, %103 : vector<1x1xf32>
    %cst_42 = arith.constant 9.99999974E-6 : f32
    %105 = vector.broadcast %cst_42 : f32 to vector<1x1xf32>
    %106 = arith.addf %104, %105 : vector<1x1xf32>
    %107 = math.rsqrt %106 : vector<1x1xf32>
    %108 = vector.broadcast %107 : vector<1x1xf32> to vector<1x32xf32>
    %109 = arith.mulf %99, %108 : vector<1x32xf32>
    %110 = arith.mulf %109, %9 : vector<1x32xf32>
    %111 = arith.addf %110, %10 : vector<1x32xf32>
    %112 = vector.shape_cast %111 : vector<1x32xf32> to vector<1x1x32xf32>
    %c0_43 = arith.constant 0 : index
    %c0_44 = arith.constant 0 : index
    %c0_45 = arith.constant 0 : index
    %113 = vector.load %arg5[%c0_43, %c0_44, %c0_45] : memref<1x1x32xf32, #tpu.memory_space<vmem>>, vector<1x1x32xf32>
    tpu.vector_store %arg5[%c0_43, %c0_44, %c0_45], %112 {strides = array<i32>} : memref<1x1x32xf32, #tpu.memory_space<vmem>>, vector<1x1x32xf32>,
    return
  }
  func.func @transform_0(%arg0: i32) -> (i32, i32, i32) {
    %c0_i32 = arith.constant 0 : i32
    %c0_i32_0 = arith.constant 0 : i32
    %c0_i32_1 = arith.constant 0 : i32
    return %arg0, %c0_i32, %c0_i32_0 : i32, i32, i32
  }
  func.func @transform_1(%arg0: i32) -> (i32, i32, i32) {
    %c0_i32 = arith.constant 0 : i32
    %c0_i32_0 = arith.constant 0 : i32
    %c0_i32_1 = arith.constant 0 : i32
    return %arg0, %c0_i32, %c0_i32_0 : i32, i32, i32
  }
  func.func @transform_2(%arg0: i32) -> (i32, i32, i32) {
    %c0_i32 = arith.constant 0 : i32
    %c0_i32_0 = arith.constant 0 : i32
    %c0_i32_1 = arith.constant 0 : i32
    return %arg0, %c0_i32, %c0_i32_0 : i32, i32, i32
  }
  func.func @transform_3(%arg0: i32) -> (i32, i32) {
    %c0_i32 = arith.constant 0 : i32
    %c0_i32_0 = arith.constant 0 : i32
    %c0_i32_1 = arith.constant 0 : i32
    return %c0_i32, %c0_i32_0 : i32, i32
  }
  func.func @transform_4(%arg0: i32) -> (i32, i32, i32) {
    %c0_i32 = arith.constant 0 : i32
    %c0_i32_0 = arith.constant 0 : i32
    %c0_i32_1 = arith.constant 0 : i32
    return %arg0, %c0_i32, %c0_i32_0 : i32, i32, i32
  }
}

</mosaic_0001>

<bundles_post_ra>
// kernel: tpu_custom_call.1
= control target key start
LH: loop header
LB: loop body
LE: loop exit
PB: predicated region body
PF: predicated region fallthrough
CT: control target
= control target key end

     0   :  { %9 = vsyncpa [#allocation3], 0  ;;  %s1662_s0 = inlined_call_operand.vmem [shape: f32[2,1,32], index: 0, kind: input, shape index: {}]   ;;  %s1663_s1 = inlined_call_operand.vmem [shape: f32[2,8,32], index: 1, kind: input, shape index: {}]   ;;  %s1664_s2 = inlined_call_operand.vmem [shape: f32[2,8,1], index: 2, kind: input, shape index: {}]   ;;  %s1665_s3 = inlined_call_operand.hbm [shape: f32[231,128], index: 3, kind: input, shape index: {}]   ;;  %s1666_s4 = inlined_call_operand.hbm [shape: f32[2,1,32], index: 4, kind: output, shape index: {}]  }
   0x1   :  { %10 = vsyncpa [#allocation4], 0 }
   0x2   :  { %12 = vsyncpa [#allocation4 + $0x1], 0  ;;  %s1434_s15 = smov 0   ;;  %s1436_s16 = smov 0  }
   0x3   :  { %s1438_s17 = smov 0   ;;  %s1440_s18 = smov 0  }
   0x4 LB: > { %s1455_s19 = sadd.s32 4294967295, %s1396_s18   ;;  %s1010_s20 = sadd.s32 4294967294, %s1396_s18   ;;  %s1396_s18 = sphi %s1440_s18, %s1682_s18   ;;  %s1392_s17 = sphi %s1438_s17, %s1681_s17   ;;  %s1388_s16 = sphi %s1436_s16, %s1680_s16   ;;  %s1384_s15 = sphi %s1434_s15, %s1679_s15  }
   0x5   : > { %s1459_s21 = sadd.s32 1, %s1396_s18   ;;  %s124_s22 = sadd.s32 1, %s1392_s17 }
   0x6   : > { %s121_s23 = ssub.s32 %s1396_s18, %s1459_s21  ;;  %p134_p0 = scmp.ne.s32.totalorder %s1392_s17, %s1388_s16 }
   0x7   : > { %p122_p1 = scmp.eq.s32.totalorder %s121_s23, 0  ;;  %p135_p2 = scmp.eq.s32.totalorder %s1455_s19, 1 }
   0x8   : > { %p140_p3 = scmp.ne.s32.totalorder %s1388_s16, %s1384_s15  ;;  %p141_p4 = scmp.eq.s32.totalorder %s1010_s20, 1 }
   0x9   : > { %s1470_s24 = scalar_select %p122_p1, %s1392_s17, %s124_s22  }
   0xa   : > { %p1472_p5 = por %p135_p2, %p134_p0  ;;  %p1476_p6 = por %p141_p4, %p140_p3 }
   0xb   : > { %p1011_p7 = scmp.ge.s32.totalorder %s1396_s18, 1  ;;  %p148_p8 = scmp.lt.s32.totalorder %s1396_s18, 3 }
   0xc   : > { %s1670_s25 = scalar_select %p1472_p5, 1, 0 }
   0xd   : > { %s1671_s26 = scalar_select %p1476_p6, 1, 0 }
   0xe   : > { %p1667_p9 = scmp.eq.s32.totalorder %s1455_s19, 0  ;;  %p1483_p10 = pnand %p1011_p7, %p148_p8 }
   0xf   : > { %s1398_s28 = smov [#allocation2]   ;;  %s1302_s7 = scalar_lea.hbm %s1665_s3, 3712 }
  0x10   : > { %s1672_s27 = scalar_select %p1483_p10, 1, 0 }
  0x11   : > { %s160_s29 = sshll.u32 %s1398_s28, 4  ;;  %p1228_p11 = pneg %p1483_p10  ;;  %s161_s29 = int_to_ptr.vmem [resolvable:$true] %s160_s29 }
  0x12   : > { %p1303_p13 = scmp.ne.s32.totalorder %s1665_s3, %s1302_s7  ;;  %p1309_p3 = scmp.lt.u32.totalorder %s1302_s7, %s1665_s3 }
  0x13   : > { %p1491_p12 = pnand %p1667_p9, %p1228_p11 }
  0x15   : > { %p1304_p0 = pneg %p1491_p12 }
  0x17   : > { %p1305_p1 = pnand %p1304_p0, %p1303_p13 }
  0x19   : > { %p1306_p2 = pneg %p1305_p1 }
  0x1b   : > { %p1311_p4 = pnand %p1309_p3, %p1306_p2 }
  0x1d   : > { %1314 = shalt.err (!%p1311_p4)
}
  0x1e   : > { %s1315_s12 = scalar_lea.vmem %s161_s29, 3712  ;;  %p1323_p9 = scmp.lt.s32.totalorder %s161_s29, %s161_s29 }
  0x1f   : > { %p1316_p7 = scmp.ne.s32.totalorder %s161_s29, %s1315_s12  ;;  %p1324_p6 = scmp.lt.s32.totalorder %s1315_s12, %s1315_s12 }
  0x21   : > { %p1318_p8 = pnand %p1316_p7, %p1304_p0  ;;  %p1325_p5 = por %p1324_p6, %p1323_p9 }
  0x23   : > { %p1319_p11 = pneg %p1318_p8 }
  0x25   : > { %p1326_p10 = pnand %p1325_p5, %p1319_p11 }
  0x27   : > { %1329 = shalt.err (!%p1326_p10)
}
  0x28   : > { %s1399_s13 = smov 128   ;;  %s1400_s14 = smov 8  }
  0x29   : > { %1231 = dma.hbm_to_vmem [thread:$0]  (!%p1491_p12), %s1665_s3, 3712, %s161_s29, [#allocation3], %s1399_s13, %s1399_s13, %s1400_s14  }
  0x2a   : > { %p1674_p13 = scmp.ne.s32.totalorder %s1672_s27, 0 }
  0x2b   : > { %p1675_p1 = scmp.eq.s32.totalorder (!%p1674_p13), %s1455_s19, 0 }
  0x2c   : > { %196 = sbr.rel (%p1674_p13) target bundleno = 2207 (0x89f), region = 36 }
  0x33   : > { %1375 = dma.done.wait (%p1675_p1), [#allocation3], 3712   ;;  %p1676_p0 = pmov %p1675_p1 }
  0x34   : > { %v1401_v0 = vmov 0.0|0.0   ;;  %vm1402_vm0 = vmmov 0   ;;  %v1403_v1 = vmov 0.0   ;;  %p227_p5 = scmp.lt.s32.totalorder %s1455_s19, 1  ;;  %v1524_v2 = vld [vmem:[#allocation2] sm:$0xff]  ;;  %v1526_v3 = vld [vmem:[#allocation2 + $0x8] sm:$0xff]  ;;  %v346_v17 = vlaneseq }
  0x35   : > { %1377 = vsyncadd (%p1676_p0), [#allocation3], 4294963584  ;;  %1168 = vmatprep.subr.bf16.mxu0 %v1401_v0  ;;  %1081 = vmatprep.mubr.msk.f32.mxu0 %vm1402_vm0, %v1403_v1  ;;  %v1528_v4 = vld [vmem:[#allocation2 + $0x10] sm:$0xff]  ;;  %v1282_v5 = vpack.i.bf16 %v1526_v3, %v1524_v2  ;;  %v1169_v6 = vpack.c.bf16 %v1526_v3, %v1524_v2  ;;  %v1537_v7 = vld [vmem:[#allocation2 + $0x18] sm:$0xff]  ;;  %vm272_vm1 = vcmask 261120   ;;  %v1404_v21 = vmov 0  }
  0x36   : > { %1186 = vmatprep.subr.bf16.mxu1 %v1401_v0  ;;  %1119 = vmatprep.mubr.msk.f32.mxu1 %vm1402_vm0, %v1403_v1  ;;  %s1531_s23 = scalar_select %p227_p5, %s1455_s19, 1  ;;  %v1172_v8 = vpack.c.bf16 %v1537_v7, %v1528_v4  ;;  %v262_v11 = vld [vmem:[#allocation2 + $0xc0] sm:$0xff]  ;;  %v263_v12 = vld [vmem:[#allocation2 + $0xc8] sm:$0xff]  ;;  %v264_v13 = vld [vmem:[#allocation2 + $0xd0] sm:$0xff]  ;;  %v347_v18 = vshrl.u32 %v346_v17, 7  ;;  %vm538_vm2 = vcmask 1043456   ;;  %v1287_v36 = vpack.i.bf16 %v1537_v7, %v1528_v4 }
  0x37   : > { %1170 = vmatpush3.bf16.msra.mxu0 %v1169_v6  ;;  %v1181_v14 = vpack.c.bf16 %v263_v12, %v262_v11  ;;  %v265_v15 = vld [vmem:[#allocation2 + $0xd8] sm:$0xff]  ;;  %1281 = vset.pattern.permute.xlu0 %v1404_v21  ;;  %v267_v23 = vld [vmem:[#allocation2 + $0xe4] sm:$0x1]  ;;  %s1405_s11 = smov 64   ;;  %s1406_s12 = smov 96   ;;  %vm515_vm3 = vcmask 31744  }
  0x38   : > { %1171 = vmatprep.subr.bf16.mxu0 %v1401_v0  ;;  %s229_s29 = scalar_lea.vmem %s1662_s0, %s1531_s23  ;;  %s1016_s30 = sshll.u32 %s1531_s23, 3  ;;  %v1184_v16 = vpack.c.bf16 %v265_v15, %v264_v13  ;;  %v348_v22 = vsub.s32 0, %v347_v18  ;;  %v266_v35 = vld [vmem:[#allocation2 + $0xe0] sm:$0xf]  ;;  %vm716_vm4 = vcmask 253952  }
  0x39   : > { %v270_v9 = vld [vmem:[%s229_s29] sm:$0x1]  ;;  %s233_s7 = scalar_lea.vmem %s1663_s1, %s1016_s30  ;;  %s237_s10 = scalar_lea.vmem %s1664_s2, %s1016_s30 }
  0x3a   : > { %v271_v10 = vld [vmem:[%s233_s7] sm:$0xff]  ;;  %v349_v25 = vrot.slane %v267_v23, %v348_v22  ;;  %s1407_s13 = smov 32   ;;  %s225_s14 = sand.u32 1, %s1388_s16  }
  0x3b   : > { %1173 = vmatpush3.bf16.msra.mxu0 %v1172_v8  ;;  %v506_v24 = vld [vmem:[%s237_s10] sm:$0xff]  ;;  %s1026_s20 = sshll.u32 %s1455_s19, 4  ;;  %s226_s22 = scalar_lea.vmem [#allocation5], %s225_s14 }
  0x3c   : > { %1174 = vmatprep.subr.bf16.mxu0 %v1401_v0  ;;  %v1021_v26 = vadd.f32 -1.0, %v506_v24  ;;  %s922_s23 = sshll.u32 %s226_s22, 4  ;;  %s1619_s29 = scalar_lea.hbm %s1666_s4, %s1026_s20  ;;  %s1621_s23 = int_to_ptr.vmem [resolvable:$true] %s922_s23 }
  0x3d   : > { %s910_s30 = scalar_lea.sflag [#allocation4], %s225_s14  ;;  %s1330_s19 = scalar_lea.vmem %s1621_s23, 16 }
  0x3e   : > { %1082 = vmatmul.mubr.msk.f32.vlgmr.msra.gmra.mrb[0].mxu0 %vm272_vm1, %v270_v9  ;;  %v508_v30 = vmul.f32 1e+09, %v1021_v26  ;;  %p1331_p6 = scmp.ne.s32.totalorder %s1621_s23, %s1330_s19  ;;  %p1677_p9 = scmp.ne.s32.totalorder %s1670_s25, 0 }
  0x3f   : > { %1176 = vmatpush3.bf16.msra.mxu0 %v1169_v6  ;;  %1092 = vmatprep.mubr.msk.f32.mxu0 %vm1402_vm0, %v1403_v1  ;;  %s1408_s5 = smov [#allocation5]  }
  0x40   : > { %1177 = vmatprep.subr.bf16.mxu0 %v1401_v0  ;;  %p1332_p10 = pnand %p1331_p6, %p1677_p9  ;;  %s1334_s6 = sshll.u32 %s1408_s5, 4  ;;  %s1335_s6 = int_to_ptr.vmem [resolvable:$false] %s1334_s6 }
  0x41   : > { %s1336_s7 = scalar_lea.vmem %s1335_s6, 32  ;;  %p1337_p2 = scmp.lt.s32.totalorder %s1621_s23, %s1335_s6 }
  0x42   : > { %p1333_p12 = pneg %p1332_p10  ;;  %p1338_p3 = scmp.lt.s32.totalorder %s1336_s7, %s1330_s19 }
  0x43   : > { %1179 = vmatpush3.bf16.msra.mxu0 %v1172_v8 }
  0x44   : > { %1180 = vmatprep.subr.bf16.mxu0 %v1401_v0  ;;  %p1339_p4 = por %p1338_p3, %p1337_p2 }
  0x46   : > { %1093 = vmatmul.mubr.msk.f32.vlgmr.msra.gmra.mrb[2].mxu0 %vm272_vm1, %v271_v10  ;;  %p1340_p7 = pnand %p1339_p4, %p1333_p12 }
  0x47   : > { %1103 = vmatprep.mubr.msk.f32.mxu0 %vm1402_vm0, %v1403_v1  ;;  %1182 = vmatpush3.bf16.msra.mxu0 %v1181_v14 }
  0x48   : > { %1183 = vmatprep.subr.bf16.mxu0 %v1401_v0 }
  0x4b   : > { %1185 = vmatpush3.bf16.msra.mxu0 %v1184_v16 }
  0x4c   : > { %1106 = vmatprep.subr.mxu0 %v1403_v1 }
 0x111   : > { %v342_v19 = vpop.f32.mrb[0].mxu0 }
 0x112   : > { %v1083_v20 = vpop.f32.mrb[1].mxu0  ;;  %v343_v31 = vadd.f32 %v342_v19, %v267_v23 }
 0x114   : > { %v426_v32 = vrot.slane %v343_v31, %v348_v22  ;;  %v244_v31 = vld [vmem:[#allocation2 + $0x30] sm:$0xff] }
 0x119   : > { %v419_v27 = vpop.f32.mrb[2].mxu0 }
 0x11a   : > { %v420_v28 = vadd.f32 %v419_v27, %v349_v25  ;;  %v1094_v29 = vpop.f32.mrb[3].mxu0 }
 0x11b   : > { %v243_v29 = vld [vmem:[#allocation2 + $0x28] sm:$0xff] }
 0x11c   : > { %612 = vrot.lane.b32.xlu1 %v420_v28, %s1405_s11  ;;  %428 = vrot.lane.b32.xlu0 %v420_v28, %s1406_s12 }
 0x120   : > { %511 = vperm.xlu0 %1281, %v508_v30   ;;  %1283 = vrot.lane.b32.xlu1 %v1282_v5, %s1407_s13 }
 0x124   : > { %640 = vrot.lane.b32.xlu0 %v267_v23, %s1407_s13  ;;  %1288 = vrot.lane.b32.xlu1 %v1287_v36, %s1407_s13  ;;  %v1587_v23 = vld [vmem:[#allocation2 + $0xe6] sm:$0x1] }
 0x18e   : > { %v429_v33 = vpop.permute.xlu0 %428  ;;  %v613_v61 = vpop.permute.xlu1 %612 }
 0x18f   : > { %v431_v34 = vmul.f32 %v429_v33, %v426_v32  ;;  %v245_v32 = vld [vmem:[#allocation2 + $0x38] sm:$0xff] }
 0x190   : > { %v1196_v33 = vpack.c.bf16 %v245_v32, %v244_v31 }
 0x191   : > { %1104 = vmatmul.mubr.msk.f32.vlgmr.msra.gmra.mrb[4].mxu0 %vm272_vm1, %v431_v34  ;;  %v246_v34 = vld [vmem:[#allocation2 + $0x40] sm:$0xff] }
 0x192   : > { %1108 = vmatprep.mubr.msk.f32.mxu0 %vm1402_vm0, %v1403_v1  ;;  %1107 = vmatpush3.msk.msra.mxu0 %vm538_vm2, %v266_v35  ;;  %v1284_v62 = vpop.permute.xlu1 %1283  ;;  %v247_v35 = vld [vmem:[#allocation2 + $0x48] sm:$0xff] }
 0x193   : > { %1192 = vmatprep.subr.bf16.mxu0 %v1401_v0  ;;  %v1286_v63 = vunpack.i.h.bf16 %v1284_v62  ;;  %v1285_v2 = vunpack.i.l.bf16 %v1284_v62  ;;  %v1199_v36 = vpack.c.bf16 %v247_v35, %v246_v34  ;;  %v259_v62 = vld [vmem:[#allocation2 + $0xa8] sm:$0xff] }
 0x195   : > { %v1187_v3 = vpack.c.bf16 %v1286_v63, %v1285_v2  ;;  %v260_v2 = vld [vmem:[#allocation2 + $0xb0] sm:$0xff] }
 0x196   : > { %v1289_v4 = vpop.permute.xlu1 %1288 }
 0x197   : > { %v1291_v5 = vunpack.i.h.bf16 %v1289_v4  ;;  %v1290_v6 = vunpack.i.l.bf16 %v1289_v4  ;;  %1188 = vmatpush3.bf16.msra.mxu1 %v1187_v3  ;;  %v261_v3 = vld [vmem:[#allocation2 + $0xb8] sm:$0xff] }
 0x198   : > { %1189 = vmatprep.subr.bf16.mxu1 %v1401_v0  ;;  %v1220_v4 = vpack.c.bf16 %v261_v3, %v260_v2 }
 0x199   : > { %v1190_v7 = vpack.c.bf16 %v1291_v5, %v1290_v6  ;;  %v268_v5 = vld [vmem:[#allocation2 + $0xe5] sm:$0x1] }
 0x19b   : > { %1191 = vmatpush3.bf16.msra.mxu1 %v1190_v7 }
 0x19c   : > { %1198 = vmatprep.subr.bf16.mxu1 %v1401_v0 }
 0x19f   : > { %v512_v38 = vpop.permute.xlu0 %511 }
 0x1a3   : > { %v641_v18 = vpop.permute.xlu0 %640 }
 0x264   : > { %v501_v37 = vpop.f32.mrb[4].mxu0 }
 0x265   : > { %v505_v39 = vmul.f32 0.35355338, %v501_v37  ;;  %v1105_v40 = vpop.f32.mrb[5].mxu0 }
 0x267   : > { %v514_v41 = vadd.f32 %v512_v38, %v505_v39 }
 0x269   : > { %v516_v42 = vsel %vm515_vm3, %v514_v41, -inf }
 0x26a   : > { %v517_v43 = vrot.slane %v516_v42, 4 }
 0x26c   : > { %v518_v44 = vmax.f32 %v516_v42, %v517_v43 }
 0x26e   : > { %v519_v45 = vrot.slane %v518_v44, 2 }
 0x270   : > { %v520_v46 = vmax.f32 %v518_v44, %v519_v45 }
 0x272   : > { %v521_v47 = vrot.slane %v520_v46, 1 }
 0x274   : > { %v522_v48 = vmax.f32 %v520_v46, %v521_v47  ;;  %v248_v46 = vld [vmem:[#allocation2 + $0x50] sm:$0xff]  ;;  %v249_v47 = vld [vmem:[#allocation2 + $0x58] sm:$0xff] }
 0x276   : > { %v523_v49 = vsub.f32 %v514_v41, %v522_v48  ;;  %v1202_v48 = vpack.c.bf16 %v249_v47, %v248_v46 }
 0x278   : > { %v524_v50 = vmul.f32 1.442695, %v523_v49  ;;  %v250_v49 = vld [vmem:[#allocation2 + $0x60] sm:$0xff] }
 0x27a   : > { %1292 = vpow2.f32 %v524_v50  ;;  %v251_v50 = vld [vmem:[#allocation2 + $0x68] sm:$0xff] }
 0x284   : > { %v1293_v51 = vpop.eup %1292 }
 0x285   : > { %v526_v52 = vsel %vm515_vm3, %v1293_v51, 0.0 }
 0x286   : > { %v527_v53 = vrot.slane %v526_v52, 4 }
 0x288   : > { %v528_v54 = vadd.f32 %v527_v53, %v526_v52  ;;  %v252_v52 = vld [vmem:[#allocation2 + $0x70] sm:$0xff]  ;;  %v253_v53 = vld [vmem:[#allocation2 + $0x78] sm:$0xff] }
 0x28a   : > { %v529_v55 = vrot.slane %v528_v54, 2 }
 0x28c   : > { %v530_v56 = vadd.f32 %v529_v55, %v528_v54  ;;  %v1208_v54 = vpack.c.bf16 %v253_v53, %v252_v52  ;;  %v254_v55 = vld [vmem:[#allocation2 + $0x80] sm:$0xff] }
 0x28e   : > { %v531_v57 = vrot.slane %v530_v56, 1 }
 0x290   : > { %v532_v58 = vadd.f32 %v531_v57, %v530_v56  ;;  %v255_v56 = vld [vmem:[#allocation2 + $0x88] sm:$0xff] }
 0x291   : > { %v1211_v57 = vpack.c.bf16 %v255_v56, %v254_v55 }
 0x292   : > { %1294 = vrcp.f32 %v532_v58  ;;  %v256_v58 = vld [vmem:[#allocation2 + $0x90] sm:$0xff] }
 0x29c   : > { %v1295_v59 = vpop.eup %1294 }
 0x29d   : > { %v534_v60 = vmul.f32 %v1295_v59, %v1293_v51  ;;  %v1205_v51 = vpack.c.bf16 %v251_v50, %v250_v49  ;;  %v257_v59 = vld [vmem:[#allocation2 + $0x98] sm:$0xff] }
 0x29f   : > { %1109 = vmatmul.mubr.msk.f32.vlgmr.msra.gmra.mrb[6].mxu0 %vm515_vm3, %v534_v60  ;;  %v1214_v60 = vpack.c.bf16 %v257_v59, %v256_v58 }
 0x2a0   : > { %1130 = vmatprep.mubr.msk.f32.mxu0 %vm1402_vm0, %v1403_v1 }
 0x372   : > { %v608_v8 = vpop.f32.mrb[6].mxu0 }
 0x373   : > { %v615_v9 = vmul.f32 %v613_v61, %v608_v8  ;;  %v1110_v10 = vpop.f32.mrb[7].mxu0  ;;  %v258_v61 = vld [vmem:[#allocation2 + $0xa0] sm:$0xff] }
 0x374   : > { %v1217_v63 = vpack.c.bf16 %v259_v62, %v258_v61 }
 0x375   : > { %v616_v11 = vsel %vm272_vm1, %v615_v9, 0.0 }
 0x376   : > { %v617_v12 = vrot.slane %v616_v11, 4 }
 0x378   : > { %v618_v13 = vadd.f32 %v617_v12, %v616_v11 }
 0x37a   : > { %v619_v14 = vrot.slane %v618_v13, 2 }
 0x37c   : > { %v620_v15 = vadd.f32 %v619_v14, %v618_v13 }
 0x37e   : > { %v621_v16 = vrot.slane %v620_v15, 1 }
 0x380   : > { %v622_v17 = vadd.f32 %v621_v16, %v620_v15 }
 0x382   : > { %1120 = vmatmul.mubr.msk.f32.vlgmr.msra.gmra.mrb[0].mxu1 %vm272_vm1, %v622_v17 }
 0x383   : > { %1165 = vmatprep.mubr.msk.f32.mxu1 %vm1402_vm0, %v1403_v1  ;;  %v242_v1 = vld [vmem:[#allocation2 + $0x20] sm:$0xff]  ;;  %1200 = vmatpush3.bf16.msra.mxu1 %v1199_v36 }
 0x384   : > { %v1193_v30 = vpack.c.bf16 %v243_v29, %v242_v1  ;;  %1201 = vmatprep.subr.bf16.mxu1 %v1401_v0 }
 0x386   : > { %1194 = vmatpush3.bf16.msra.mxu0 %v1193_v30 }
 0x387   : > { %1195 = vmatprep.subr.bf16.mxu0 %v1401_v0  ;;  %1203 = vmatpush3.bf16.msra.mxu1 %v1202_v48 }
 0x388   : > { %1204 = vmatprep.subr.bf16.mxu1 %v1401_v0 }
 0x38a   : > { %1197 = vmatpush3.bf16.msra.mxu0 %v1196_v33 }
 0x38b   : > { %1206 = vmatpush3.bf16.msra.mxu1 %v1205_v51 }
 0x38c   : > { %1207 = vmatprep.subr.bf16.mxu1 %v1401_v0 }
 0x38f   : > { %1209 = vmatpush3.bf16.msra.mxu1 %v1208_v54 }
 0x390   : > { %1210 = vmatprep.subr.bf16.mxu1 %v1401_v0 }
 0x393   : > { %1212 = vmatpush3.bf16.msra.mxu1 %v1211_v57 }
 0x394   : > { %1213 = vmatprep.subr.bf16.mxu1 %v1401_v0 }
 0x397   : > { %1215 = vmatpush3.bf16.msra.mxu1 %v1214_v60 }
 0x398   : > { %1216 = vmatprep.subr.bf16.mxu1 %v1401_v0 }
 0x39b   : > { %1218 = vmatpush3.bf16.msra.mxu1 %v1217_v63 }
 0x39c   : > { %1219 = vmatprep.subr.bf16.mxu1 %v1401_v0 }
 0x39f   : > { %1221 = vmatpush3.bf16.msra.mxu1 %v1220_v4 }
 0x455   : > { %v712_v19 = vpop.f32.mrb[0].mxu1 }
 0x456   : > { %v713_v20 = vadd.f32 %v712_v19, %v641_v18  ;;  %v1121_v21 = vpop.f32.mrb[1].mxu1 }
 0x458   : > { %v717_v22 = vsel %vm716_vm4, %v713_v20, 0.0 }
 0x459   : > { %718 = vadd.xlane.f32.xlu1 %v717_v22 }
 0x46a   : > { %736 = vrot.lane.b32.xlu1 %v1587_v23, %s1405_s11 }
 0x4e6   : > { %v719_v24 = vpop.xlane.xlu1 %718 }
 0x4e7   : > { %v721_v25 = vmul.f32 0.03125, %v719_v24 }
 0x4e9   : > { %v722_v26 = vsub.f32 %v713_v20, %v721_v25 }
 0x4ea   : > { %v1598_v43 = vpop.permute.xlu1 %736 }
 0x4eb   : > { %v723_v27 = vmul.f32 %v722_v26, %v722_v26 }
 0x4ed   : > { %v724_v28 = vsel %vm716_vm4, %v723_v27, 0.0 }
 0x4ee   : > { %725 = vadd.xlane.f32.xlu0 %v724_v28 }
 0x504   : > { %732 = vrot.lane.b32.xlu0 %v1587_v23, %s1406_s12 }
 0x57b   : > { %v726_v37 = vpop.xlane.xlu0 %725 }
 0x57c   : > { %v727_v38 = vmul.f32 0.03125, %v726_v37 }
 0x57e   : > { %v728_v39 = vadd.f32 1e-05, %v727_v38 }
 0x57f   : > { %v1596_v41 = vpop.permute.xlu0 %732 }
 0x580   : > { %1296 = vrsqrt.f32 %v728_v39 }
 0x58a   : > { %v1297_v40 = vpop.eup %1296 }
 0x58b   : > { %v730_v42 = vmul.f32 %v1297_v40, %v722_v26 }
 0x58d   : > { %v735_v44 = vmul.f32 %v1596_v41, %v730_v42 }
 0x58f   : > { %v739_v45 = vadd.f32 %v1598_v43, %v735_v44 }
 0x591   : > { %1131 = vmatmul.mubr.msk.f32.vlgmr.msra.gmra.mrb[8].mxu0 %vm272_vm1, %v739_v45 }
 0x664   : > { %v809_v6 = vpop.f32.mrb[8].mxu0 }
 0x665   : > { %v810_v7 = vadd.f32 %v809_v6, %v268_v5  ;;  %v1132_v8 = vpop.f32.mrb[9].mxu0 }
 0x667   : > { %v814_v9 = vmul.f32 0.044715, %v810_v7  ;;  %v813_v15 = vmul.f32 0.5, %v810_v7 }
 0x669   : > { %v815_v10 = vmul.f32 %v814_v9, %v810_v7 }
 0x66b   : > { %v816_v11 = vmul.f32 %v815_v10, %v810_v7 }
 0x66d   : > { %v817_v12 = vadd.f32 %v816_v11, %v810_v7 }
 0x66f   : > { %v818_v13 = vmul.f32 0.7978846, %v817_v12 }
 0x671   : > { %1298 = vtanh.f32 %v818_v13 }
 0x67b   : > { %v1299_v14 = vpop.eup %1298 }
 0x67c   : > { %v820_v16 = vadd.f32 1.0, %v1299_v14 }
 0x67e   : > { %v821_v17 = vmul.f32 %v820_v16, %v813_v15 }
 0x680   : > { %1166 = vmatmul.mubr.f32.vlgmr.msra.gmra.mrb[2].mxu1 %v821_v17 }
 0x753   : > { %v888_v18 = vpop.f32.mrb[2].mxu1 }
 0x754   : > { %v889_v0 = vadd.f32 %v888_v18, %v1587_v23  ;;  %v1167_v19 = vpop.f32.mrb[3].mxu1 }
 0x756   : > { %v892_v20 = vadd.f32 %v889_v0, %v739_v45 }
 0x758   : > { %v893_v21 = vsel %vm716_vm4, %v892_v20, 0.0 }
 0x759   : > { %894 = vadd.xlane.f32.xlu1 %v893_v21 }
 0x7e6   : > { %v895_v22 = vpop.xlane.xlu1 %894 }
 0x7e7   : > { %v896_v24 = vmul.f32 0.03125, %v895_v22 }
 0x7e9   : > { %v897_v25 = vsub.f32 %v892_v20, %v896_v24 }
 0x7eb   : > { %v898_v26 = vmul.f32 %v897_v25, %v897_v25 }
 0x7ed   : > { %v899_v27 = vsel %vm716_vm4, %v898_v26, 0.0 }
 0x7ee   : > { %900 = vadd.xlane.f32.xlu0 %v899_v27 }
 0x87b   : > { %v901_v28 = vpop.xlane.xlu0 %900 }
 0x87c   : > { %v902_v1 = vmul.f32 0.03125, %v901_v28 }
 0x87e   : > { %v903_v29 = vadd.f32 1e-05, %v902_v1 }
 0x880   : > { %1300 = vrsqrt.f32 %v903_v29 }
 0x88a   : > { %v1301_v23 = vpop.eup %1300 }
 0x88b   : > { %v905_v30 = vmul.f32 %v1301_v23, %v897_v25 }
 0x88d   : > { %v906_v31 = vmul.f32 %v905_v30, %v1596_v41 }
 0x88f   : > { %v907_v32 = vadd.f32 %v906_v31, %v1598_v43 }
 0x891   : > { %908 = vst.msk [vmem:[%s226_s22] sm:$0x1] %vm716_vm4, %v907_v32 }
 0x892   : > { %1343 = shalt.err (!%p1340_p7)
}
 0x893   : > { %s1344_s8 = scalar_lea.hbm %s1619_s29, 16  ;;  %s1348_s11 = scalar_lea.hbm %s1666_s4, 32 }
 0x894   : > { %p1345_p8 = scmp.ne.s32.totalorder %s1619_s29, %s1344_s8  ;;  %p1349_p1 = scmp.lt.u32.totalorder %s1619_s29, %s1666_s4 }
 0x895   : > { %p1350_p0 = scmp.lt.u32.totalorder %s1348_s11, %s1344_s8  ;;  %p1352_p6 = scmp.lt.u32.totalorder %s1344_s8, %s1619_s29 }
 0x896   : > { %p1346_p11 = pnand %p1345_p8, %p1677_p9 }
 0x897   : > { %p1351_p5 = por %p1350_p0, %p1349_p1 }
 0x898   : > { %p1347_p13 = pneg %p1346_p11 }
 0x899   : > { %p1353_p10 = por %p1352_p6, %p1351_p5 }
 0x89b   : > { %p1354_p12 = pnand %p1353_p10, %p1347_p13 }
 0x89d   : > { %1357 = shalt.err (!%p1354_p12)
}
 0x89e   : > { %1226 = dma.vmem_to_hbm [thread:$0]  (%p1677_p9), %s1621_s23, 16, %s1619_s29, %s910_s30  }
 0x89f PF: > { %p1238_p2 = scmp.ge.s32.totalorder %s1396_s18, 2  ;;  %s934_s14 = sand.u32 1, %s1384_s15  }
 0x8a0   : > { %p1678_p3 = scmp.ne.s32.totalorder %s1671_s26, 0  ;;  %s935_s20 = scalar_lea.sflag [#allocation4], %s934_s14 }
 0x8a2   : > { %p1233_p4 = pnand %p1238_p2, %p1678_p3 }
 0x8a4   : > { %1379 = dma.done.wait (!%p1233_p4), %s935_s20, 16  }
 0x8a5   : > { %1381 = vsyncadd (!%p1233_p4), %s935_s20, 4294967280  ;;  %p15_p7 = scmp.ge.s32.totalorder %s1459_s21, 4   ;;  %s1679_s15 = smov %s1388_s16 }
 0x8a6   : > { %s1680_s16 = smov %s1392_s17  ;;  %s1681_s17 = smov %s1470_s24 }
 0x8a7   : > { %s1682_s18 = smov %s1459_s21  ;;  %17 = sbr.rel (!%p15_p7) target bundleno = 4 (0x4), region = 82 }
 0x8ae   :  { %939 = vsyncpa [#allocation3], 1 }
 0x8af   :  { %941 = vsyncpa [#allocation3 + $0x1], 1 }
 0x8b0   :  { %942 = vsyncpa [#allocation4], 1 }
 0x8b1   :  { %944 = vsyncpa [#allocation4 + $0x1], 1 }

</bundles_post_ra>
